<compile_context>
chip_gen: v7x
topology: tpu7x:2x2x1
jax: 0.10.0
libtpu: 0.0.40
codegen_flags: <defaults>
</compile_context>

<pallas_src>
import jax
import jax.numpy as jnp
import numpy as np
from jax.experimental import pallas as pl
from jax.experimental.pallas import tpu as pltpu

EPS_BN = 1e-5


# --------------------------------------------------------------------------
# Kernel 1: normalize_point_batch (NCHW=True semantics) + layer0 conv1x1 + BN
# --------------------------------------------------------------------------
def _norm_layer0_kernel(xyz_ref, w_ref, shift_ref, out_ref):
    # xyz_ref: (1, N, 3)   w_ref: (3, 24) with BN scale folded   out: (1, N, 24)
    xyz = xyz_ref[0]                                           # (N, 3)
    centroid = jnp.mean(xyz, axis=0, keepdims=True)            # (1, 3)
    xc = xyz - centroid
    radius = jnp.max(jnp.sqrt(jnp.sum(xc * xc, axis=1, keepdims=True)),
                     axis=0, keepdims=True)                    # (1, 1)
    xn = xc / radius
    # 1x1 conv (3 -> 24): a 3-deep contraction wastes an MXU pass; do it as
    # three broadcast FMAs on the VPU instead.
    z = (xn[:, 0:1] * w_ref[0:1, :]
         + xn[:, 1:2] * w_ref[1:2, :]
         + xn[:, 2:3] * w_ref[2:3, :])                         # (N, 24)
    out_ref[0] = z + shift_ref[...]


def normalize_and_layer0(xyz_bnc, w0, shift0):
    B, N, _ = xyz_bnc.shape
    C_out = w0.shape[1]
    return pl.pallas_call(
        _norm_layer0_kernel,
        out_shape=jax.ShapeDtypeStruct((B, N, C_out), jnp.float32),
        grid=(B,),
        in_specs=[
            pl.BlockSpec((1, N, 3), lambda b: (b, 0, 0)),
            pl.BlockSpec(w0.shape, lambda b: (0, 0)),
            pl.BlockSpec(shift0.shape, lambda b: (0, 0)),
        ],
        out_specs=pl.BlockSpec((1, N, C_out), lambda b: (b, 0, 0)),
        compiler_params=pltpu.CompilerParams(
            dimension_semantics=("parallel",)),
    )(xyz_bnc, w0, shift0)


# --------------------------------------------------------------------------
# Kernel 2: DC_Edgeconv dense block (n=3, growth_rate=12) + max over k.
# The whole neighbor axis K lives inside the block; each grid step handles one
# (batch, N-tile) pair and writes all 84 output channels in one store.
# --------------------------------------------------------------------------
def _dc_edgeconv_kernel(knn_ref, x_ref,
                        w0a, w0b, b0,
                        w1a, w1b, b1,
                        w2ab, w2c, b2,
                        out_ref):
    x = x_ref[0]                              # (NT, 24) center features
    knn = knn_ref[0]                          # (K, NT, 24) gathered neighbors
    K, NT, C = knn.shape
    G = b0.shape[-1]                          # growth rate (12)

    diff = knn - x[None, :, :]                # second half of [x, NN-x]

    # k-invariant center projections, computed ONCE per tile (BN scale already
    # folded into the weights; BN shift folded into the per-mlp bias here).
    px0 = jnp.dot(x, w0a[...], preferred_element_type=jnp.float32) + b0[...]
    px1 = jnp.dot(x, w1b[...], preferred_element_type=jnp.float32) + b1[...]
    px2 = jnp.dot(x, w2c[...], preferred_element_type=jnp.float32) + b2[...]

    # mlp0: conv1x1(48 -> 12) on [x, NN-x] + BN + ReLU   (x-part hoisted)
    z0 = jnp.dot(diff.reshape(K * NT, C), w0b[...],
                 preferred_element_type=jnp.float32).reshape(K, NT, G)
    y0 = jnp.maximum(z0 + px0[None], 0.0)                       # (K, NT, 12)

    # mlp1: conv1x1(36 -> 12) on [y0, x] + BN + ReLU      (x-part hoisted)
    z1 = jnp.dot(y0.reshape(K * NT, G), w1a[...],
                 preferred_element_type=jnp.float32).reshape(K, NT, G)
    y1 = jnp.maximum(z1 + px1[None], 0.0)                       # (K, NT, 12)

    # mlp2: conv1x1(48 -> 12) on [y1, y0, x] + BN (no ReLU on last dense layer)
    h = jnp.concatenate([y1, y0], axis=-1).reshape(K * NT, 2 * G)
    z2 = jnp.dot(h, w2ab[...],
                 preferred_element_type=jnp.float32).reshape(K, NT, G)
    y2 = z2 + px2[None]                                         # (K, NT, 12)

    # max over the neighbor axis, then ONE lane-dense store of all channels:
    # DC_Edgeconv output is [y2, y1, y0, x_rep]; max_k(x_rep) == x, and the
    # GraphEncoder appends x again -> 84 channels total.
    out_ref[0] = jnp.concatenate(
        [jnp.max(y2, axis=0), jnp.max(y1, axis=0), jnp.max(y0, axis=0), x, x],
        axis=-1)


def dc_edgeconv_dense(knn_bknc, x_bnc, params, n_tile=None):
    B, K, N, C = knn_bknc.shape
    G = params[2].shape[-1]                  # growth rate (12)
    C_out = 3 * G + 2 * C                    # [y2, y1, y0, x, x] = 84

    if n_tile is None:
        # Largest N-tile whose double-buffered f32 knn block stays well under
        # the scoped VMEM budget (v7x: 64 MiB physical / 32 MiB default).
        n_tile = N
        while n_tile > 8 and 2 * K * n_tile * C * 4 > 8 * 1024 * 1024:
            n_tile //= 2
    assert N % n_tile == 0 and (n_tile == N or n_tile % 8 == 0)

    param_specs = [pl.BlockSpec(p.shape, lambda b, t: (0, 0)) for p in params]
    return pl.pallas_call(
        _dc_edgeconv_kernel,
        out_shape=jax.ShapeDtypeStruct((B, N, C_out), jnp.float32),
        grid=(B, N // n_tile),
        in_specs=[pl.BlockSpec((1, K, n_tile, C), lambda b, t: (b, 0, t, 0)),
                  pl.BlockSpec((1, n_tile, C), lambda b, t: (b, t, 0))]
                 + param_specs,
        out_specs=pl.BlockSpec((1, n_tile, C_out), lambda b, t: (b, t, 0)),
        compiler_params=pltpu.CompilerParams(
            dimension_semantics=("parallel", "parallel")),
    )(knn_bknc, x_bnc, *params)


# --------------------------------------------------------------------------
# JAX glue: kNN selection/gather, parameter folding, boundary transposes
# --------------------------------------------------------------------------
def knn_indices(x_bnc, k):
    # group_knn(k+1, x, x) then drop the self neighbor (index 0).
    # TODO(synk): for large N, block this O(N^2) distance/top-k computation;
    # at scale it, not the Pallas kernels, dominates HBM traffic and FLOPs.
    sq = jnp.sum(x_bnc * x_bnc, axis=-1)                        # (B, N)
    dist = (sq[:, :, None] + sq[:, None, :]
            - 2.0 * jnp.einsum('bic,bjc->bij', x_bnc, x_bnc))   # (B, N, N)
    _, idx = jax.lax.top_k(-dist, k + 1)                        # ascending dist
    return idx[:, :, 1:]                                        # (B, N, k)


def graph_encoder_forward(xyz_bcn, p, k=16):
    """xyz_bcn: (B, 3, N) channels-first, like the PyTorch module."""
    B, _, N = xyz_bcn.shape
    xyz = jnp.transpose(xyz_bcn, (0, 2, 1))                     # (B, N, 3)

    # Kernel 1: normalize_point_batch + layer0 (conv1x1 + BN, scale folded).
    w_l0 = p['w_l0'] * p['s_l0']
    x = normalize_and_layer0(xyz, w_l0, p['b_l0'])              # (B, N, 24)

    # TODO(synk): top-k neighbor selection is a data-dependent sort with no
    # clean Pallas equivalent; it stays in plain JAX glue.
    idx = knn_indices(x, k)                                     # (B, N, k)

    # Gather directly in (B, K, N, C) order so the 16x-sized gathered tensor
    # is never transposed through HBM.
    # TODO(synk): an in-kernel gather (scalar-prefetched idx + per-row DMA)
    # would avoid materializing the gathered tensor in HBM entirely.
    idx_t = jnp.swapaxes(idx, 1, 2)                             # (B, k, N)
    knn = jax.vmap(lambda xb, ib: xb[ib])(x, idx_t)             # (B, k, N, 24)

    # Fold BN scale into the conv weights; only the shift remains as a bias.
    w_m0 = p['w_m0'] * p['s_m0']
    w_m1 = p['w_m1'] * p['s_m1']
    w_m2 = p['w_m2'] * p['s_m2']
    dense_params = (w_m0[:24], w_m0[24:], p['b_m0'],    # mlp0 on [x, nn-x]
                    w_m1[:12], w_m1[12:], p['b_m1'],    # mlp1 on [y0, x]
                    w_m2[:24], w_m2[24:], p['b_m2'])    # mlp2 on [[y1,y0], x]

    feats = dc_edgeconv_dense(knn, x, dense_params)             # (B, N, 84)
    return jnp.transpose(feats, (0, 2, 1))                      # (B, 84, N)


def init_params(key):
    ks = jax.random.split(key, 8)

    def conv_w(kk, cin, cout):
        # torch weight is (cout, cin, 1, 1); stored transposed as (cin, cout)
        return 0.2 * jax.random.normal(kk, (cin, cout), jnp.float32)

    def bn(kk, c):
        kg, kb, km, kv = jax.random.split(kk, 4)
        gamma = 1.0 + 0.1 * jax.random.normal(kg, (c,), jnp.float32)
        beta = 0.1 * jax.random.normal(kb, (c,), jnp.float32)
        mean = 0.1 * jax.random.normal(km, (c,), jnp.float32)
        var = jax.random.uniform(kv, (c,), jnp.float32, minval=0.5, maxval=1.5)
        scale = gamma / jnp.sqrt(var + EPS_BN)
        shift = beta - mean * scale
        return scale.reshape(1, c), shift.reshape(1, c)

    p = {}
    p['w_l0'] = conv_w(ks[0], 3, 24)                 # layer0: 3 -> 24
    p['s_l0'], p['b_l0'] = bn(ks[1], 24)
    p['w_m0'] = conv_w(ks[2], 48, 12)                # mlp0: 2*24 -> 12
    p['s_m0'], p['b_m0'] = bn(ks[3], 12)
    p['w_m1'] = conv_w(ks[4], 36, 12)                # mlp1: 24+12 -> 12
    p['s_m1'], p['b_m1'] = bn(ks[5], 12)
    p['w_m2'] = conv_w(ks[6], 48, 12)                # mlp2: 36+12 -> 12
    p['s_m2'], p['b_m2'] = bn(ks[7], 12)
    return p


# --------------------------------------------------------------------------
# Pure-JAX reference (mirrors the PyTorch forward, unfolded BN) for validation
# --------------------------------------------------------------------------
def reference_forward(xyz_bcn, p, k=16):
    xyz = jnp.transpose(xyz_bcn, (0, 2, 1))                     # (B, N, 3)
    centroid = jnp.mean(xyz, axis=1, keepdims=True)
    xc = xyz - centroid
    radius = jnp.max(jnp.sqrt(jnp.sum(xc * xc, axis=-1, keepdims=True)),
                     axis=1, keepdims=True)
    xn = xc / radius
    x = xn @ p['w_l0'] * p['s_l0'] + p['b_l0']                  # (B, N, 24)

    idx = knn_indices(x, k)
    knn = jax.vmap(lambda xb, ib: xb[ib])(x, idx)               # (B, N, k, 24)
    center = jnp.broadcast_to(x[:, :, None, :], knn.shape)
    edge = jnp.concatenate([center, knn - center], axis=-1)     # (B, N, k, 48)

    y0 = jnp.maximum(edge @ p['w_m0'] * p['s_m0'] + p['b_m0'], 0.0)
    h0 = jnp.concatenate([y0, center], axis=-1)                 # (B, N, k, 36)
    y1 = jnp.maximum(h0 @ p['w_m1'] * p['s_m1'] + p['b_m1'], 0.0)
    h1 = jnp.concatenate([y1, h0], axis=-1)                     # (B, N, k, 48)
    y2 = h1 @ p['w_m2'] * p['s_m2'] + p['b_m2']
    h2 = jnp.concatenate([y2, h1], axis=-1)                     # (B, N, k, 60)
    ymax = jnp.max(h2, axis=2)                                  # (B, N, 60)
    out = jnp.concatenate([ymax, x], axis=-1)                   # (B, N, 84)
    return jnp.transpose(out, (0, 2, 1))                        # (B, 84, N)


if __name__ == "__main__":
    B, N, K = 2, 64, 16
    key = jax.random.PRNGKey(0)
    k_pts, k_par = jax.random.split(key)
    xyz = jax.random.normal(k_pts, (B, 3, N), jnp.float32)
    params = init_params(k_par)

    out = graph_encoder_forward(xyz, params, k=K)
    out = jax.block_until_ready(out)
    assert out.shape == (B, 3 * 12 + 24 + 24, N), out.shape

    ref = reference_forward(xyz, params, k=K)
    np.testing.assert_allclose(np.asarray(out), np.asarray(ref),
                               rtol=5e-4, atol=5e-4)
    print("KERNEL_OK")
</pallas_src>

<mosaic_0001>
module attributes {stable_mosaic.version = 11 : i64} {
  func.func @_norm_layer0_kernel(%arg0: i32, %arg1: memref<1x64x3xf32, #tpu.memory_space<vmem>>, %arg2: memref<3x24xf32, #tpu.memory_space<vmem>>, %arg3: memref<1x24xf32, #tpu.memory_space<vmem>>, %arg4: memref<1x64x24xf32, #tpu.memory_space<vmem>>) attributes {dimension_semantics = [#tpu.dimension_semantics<parallel>], iteration_bounds = array<i64: 2>, scalar_prefetch = 0 : i64, scratch_operands = 0 : i64, tpu.core_type = #tpu.core_type<tc>, window_params = [{transform_indices = @transform_0, window_bounds = array<i64: 1, 64, 3>}, {pipeline_mode = #tpu.pipeline_mode<synchronous>, transform_indices = @transform_1, window_bounds = array<i64: 3, 24>}, {pipeline_mode = #tpu.pipeline_mode<synchronous>, transform_indices = @transform_2, window_bounds = array<i64: 1, 24>}, {transform_indices = @transform_3, window_bounds = array<i64: 1, 64, 24>}]} {
    %c0 = arith.constant 0 : index
    %c0_0 = arith.constant 0 : index
    %c0_1 = arith.constant 0 : index
    %0 = vector.load %arg1[%c0, %c0_0, %c0_1] : memref<1x64x3xf32, #tpu.memory_space<vmem>>, vector<1x64x3xf32>
    %1 = vector.shape_cast %0 : vector<1x64x3xf32> to vector<64x3xf32>
    %cst = arith.constant dense<0.000000e+00> : vector<3xf32>
    %2 = vector.multi_reduction <add>, %1, %cst [0] : vector<64x3xf32> to vector<3xf32>
    %3 = vector.shape_cast %2 : vector<3xf32> to vector<1x3xf32>
    %cst_2 = arith.constant 6.400000e+01 : f32
    %4 = vector.broadcast %cst_2 : f32 to vector<1x3xf32>
    %5 = arith.divf %3, %4 : vector<1x3xf32>
    %6 = vector.broadcast %5 : vector<1x3xf32> to vector<64x3xf32>
    %7 = arith.subf %1, %6 : vector<64x3xf32>
    %8 = arith.mulf %7, %7 : vector<64x3xf32>
    %cst_3 = arith.constant dense<0.000000e+00> : vector<64xf32>
    %9 = vector.multi_reduction <add>, %8, %cst_3 [1] : vector<64x3xf32> to vector<64xf32>
    %10 = vector.shape_cast %9 : vector<64xf32> to vector<64x1xf32>
    %11 = math.sqrt %10 : vector<64x1xf32>
    %cst_4 = arith.constant dense<0xFF800000> : vector<1xf32>
    %12 = vector.multi_reduction <maximumf>, %11, %cst_4 [0] : vector<64x1xf32> to vector<1xf32>
    %13 = vector.shape_cast %12 : vector<1xf32> to vector<1x1xf32>
    %14 = vector.broadcast %13 : vector<1x1xf32> to vector<64x3xf32>
    %15 = arith.divf %7, %14 : vector<64x3xf32>
    %16 = vector.extract_strided_slice %15 {offsets = [0, 0], sizes = [64, 1], strides = [1, 1]} : vector<64x3xf32> to vector<64x1xf32>
    %c0_5 = arith.constant 0 : index
    %c0_6 = arith.constant 0 : index
    %17 = vector.load %arg2[%c0_5, %c0_6] : memref<3x24xf32, #tpu.memory_space<vmem>>, vector<1x24xf32>
    %18 = vector.broadcast %16 : vector<64x1xf32> to vector<64x24xf32>
    %19 = vector.broadcast %17 : vector<1x24xf32> to vector<64x24xf32>
    %20 = arith.mulf %18, %19 : vector<64x24xf32>
    %21 = vector.extract_strided_slice %15 {offsets = [0, 1], sizes = [64, 1], strides = [1, 1]} : vector<64x3xf32> to vector<64x1xf32>
    %c1 = arith.constant 1 : index
    %c0_7 = arith.constant 0 : index
    %22 = vector.load %arg2[%c1, %c0_7] : memref<3x24xf32, #tpu.memory_space<vmem>>, vector<1x24xf32>
    %23 = vector.broadcast %21 : vector<64x1xf32> to vector<64x24xf32>
    %24 = vector.broadcast %22 : vector<1x24xf32> to vector<64x24xf32>
    %25 = arith.mulf %23, %24 : vector<64x24xf32>
    %26 = arith.addf %20, %25 : vector<64x24xf32>
    %27 = vector.extract_strided_slice %15 {offsets = [0, 2], sizes = [64, 1], strides = [1, 1]} : vector<64x3xf32> to vector<64x1xf32>
    %c2 = arith.constant 2 : index
    %c0_8 = arith.constant 0 : index
    %28 = vector.load %arg2[%c2, %c0_8] : memref<3x24xf32, #tpu.memory_space<vmem>>, vector<1x24xf32>
    %29 = vector.broadcast %27 : vector<64x1xf32> to vector<64x24xf32>
    %30 = vector.broadcast %28 : vector<1x24xf32> to vector<64x24xf32>
    %31 = arith.mulf %29, %30 : vector<64x24xf32>
    %32 = arith.addf %26, %31 : vector<64x24xf32>
    %c0_9 = arith.constant 0 : index
    %c0_10 = arith.constant 0 : index
    %33 = vector.load %arg3[%c0_9, %c0_10] : memref<1x24xf32, #tpu.memory_space<vmem>>, vector<1x24xf32>
    %34 = vector.broadcast %33 : vector<1x24xf32> to vector<64x24xf32>
    %35 = arith.addf %32, %34 : vector<64x24xf32>
    %c0_11 = arith.constant 0 : index
    %c0_12 = arith.constant 0 : index
    %c0_13 = arith.constant 0 : index
    %36 = vector.load %arg4[%c0_11, %c0_12, %c0_13] : memref<1x64x24xf32, #tpu.memory_space<vmem>>, vector<1x64x24xf32>
    %37 = vector.shape_cast %36 : vector<1x64x24xf32> to vector<64x24xf32>
    %38 = vector.shape_cast %35 : vector<64x24xf32> to vector<1x64x24xf32>
    tpu.vector_store %arg4[%c0_11, %c0_12, %c0_13], %38 {strides = array<i32>} : memref<1x64x24xf32, #tpu.memory_space<vmem>>, vector<1x64x24xf32>,
    return
  }
  func.func @transform_0(%arg0: i32) -> (i32, i32, i32) {
    %c0_i32 = arith.constant 0 : i32
    %c0_i32_0 = arith.constant 0 : i32
    %c0_i32_1 = arith.constant 0 : i32
    return %arg0, %c0_i32, %c0_i32_0 : i32, i32, i32
  }
  func.func @transform_1(%arg0: i32) -> (i32, i32) {
    %c0_i32 = arith.constant 0 : i32
    %c0_i32_0 = arith.constant 0 : i32
    %c0_i32_1 = arith.constant 0 : i32
    return %c0_i32, %c0_i32_0 : i32, i32
  }
  func.func @transform_2(%arg0: i32) -> (i32, i32) {
    %c0_i32 = arith.constant 0 : i32
    %c0_i32_0 = arith.constant 0 : i32
    %c0_i32_1 = arith.constant 0 : i32
    return %c0_i32, %c0_i32_0 : i32, i32
  }
  func.func @transform_3(%arg0: i32) -> (i32, i32, i32) {
    %c0_i32 = arith.constant 0 : i32
    %c0_i32_0 = arith.constant 0 : i32
    %c0_i32_1 = arith.constant 0 : i32
    return %arg0, %c0_i32, %c0_i32_0 : i32, i32, i32
  }
}

</mosaic_0001>

<bundles_post_ra>
// kernel: tpu_custom_call.1
= control target key start
LH: loop header
LB: loop body
LE: loop exit
PB: predicated region body
PF: predicated region fallthrough
CT: control target
= control target key end

     0   :  { %s642_s12 = smov 0   ;;  %s837_s0 = inlined_call_operand.vmem [shape: f32[2,64,3], index: 0, kind: input, shape index: {}]   ;;  %s838_s1 = inlined_call_operand.vmem [shape: f32[3,24], index: 1, kind: input, shape index: {}]   ;;  %s839_s2 = inlined_call_operand.vmem [shape: f32[1,24], index: 2, kind: input, shape index: {}]   ;;  %s840_s3 = inlined_call_operand.vmem [shape: f32[2,64,24], index: 3, kind: output, shape index: {}]  }
   0x1 LB: > { %s559_s13 = sadd.s32 4294967295, %s617_s12   ;;  %p563_p0 = scmp.ge.s32.totalorder %s617_s12, 1  ;;  %s617_s12 = sphi %s642_s12, %s13_s12  }
   0x2   : > { %p137_p1 = scmp.lt.s32.totalorder %s617_s12, 3 }
   0x4   : > { %p138_p2 = pnand %p563_p0, %p137_p1 }
   0x5   : > { %p161_p3 = scmp.lt.s32.totalorder (!%p138_p2), %s559_s13, 1  ;;  %vm179_vm0 = vcmask (!%p138_p2), 23552   ;;  %v619_v54 = vmov (!%p138_p2), 0  }
   0x6   : > { %141 = sbr.rel (%p138_p2) target bundleno = 449 (0x1c1), region = 32  ;;  %588 = vset.pattern.permute.xlu1 (!%p138_p2), %v619_v54  ;;  %587 = vset.pattern.permute.xlu0 (!%p138_p2), %v619_v54 }
   0xd   : > { %s842_s13 = smov (!%p161_p3, %s559_s13), 1 }
   0xe   : > { %s574_s14 = sshll.u32 %s842_s13, 6 }
   0xf   : > { %s165_s17 = scalar_lea.vmem %s837_s0, %s574_s14  ;;  %s799_s28 = scalar_lea.vmem %s840_s3, %s574_s14 }
  0x10   : > { %v171_v0 = vld [vmem:[%s165_s17] sm:$0xff]  ;;  %v172_v1 = vld [vmem:[%s165_s17 + $0x8] sm:$0xff]  ;;  %v173_v2 = vld [vmem:[%s165_s17 + $0x10] sm:$0xff] }
  0x11   : > { %v174_v3 = vld [vmem:[%s165_s17 + $0x18] sm:$0xff]  ;;  %v180_v4 = vsel %vm179_vm0, %v171_v0, 0.0  ;;  %v181_v5 = vsel %vm179_vm0, %v172_v1, 0.0  ;;  %v183_v6 = vsel %vm179_vm0, %v173_v2, 0.0  ;;  %v175_v7 = vld [vmem:[%s165_s17 + $0x20] sm:$0xff]  ;;  %v176_v10 = vld [vmem:[%s165_s17 + $0x28] sm:$0xff] }
  0x12   : > { %v182_v8 = vadd.f32 %v181_v5, %v180_v4  ;;  %v185_v9 = vsel %vm179_vm0, %v174_v3, 0.0  ;;  %v187_v12 = vsel %vm179_vm0, %v175_v7, 0.0  ;;  %v177_v13 = vld [vmem:[%s165_s17 + $0x30] sm:$0xff]  ;;  %v189_v15 = vsel %vm179_vm0, %v176_v10, 0.0  ;;  %v178_v16 = vld [vmem:[%s165_s17 + $0x38] sm:$0xff] }
  0x13   : > { %v191_v18 = vsel %vm179_vm0, %v177_v13, 0.0  ;;  %v193_v20 = vsel %vm179_vm0, %v178_v16, 0.0 }
  0x14   : > { %v184_v11 = vadd.f32 %v183_v6, %v182_v8 }
  0x16   : > { %v186_v14 = vadd.f32 %v185_v9, %v184_v11 }
  0x18   : > { %v188_v17 = vadd.f32 %v187_v12, %v186_v14 }
  0x1a   : > { %v190_v19 = vadd.f32 %v189_v15, %v188_v17 }
  0x1c   : > { %v192_v21 = vadd.f32 %v191_v18, %v190_v19 }
  0x1e   : > { %v194_v22 = vadd.f32 %v193_v20, %v192_v21 }
  0x20   : > { %v195_v23 = vrot.slane %v194_v22, 4 }
  0x22   : > { %v196_v24 = vadd.f32 %v195_v23, %v194_v22 }
  0x24   : > { %v197_v25 = vrot.slane %v196_v24, 2 }
  0x26   : > { %v198_v26 = vadd.f32 %v197_v25, %v196_v24 }
  0x28   : > { %v199_v27 = vrot.slane %v198_v26, 1 }
  0x2a   : > { %v200_v28 = vadd.f32 %v199_v27, %v198_v26 }
  0x2c   : > { %v202_v29 = vmul.f32 0.015625, %v200_v28 }
  0x2e   : > { %v666_v30 = vsub.f32 %v173_v2, %v202_v29  ;;  %v668_v31 = vsub.f32 %v171_v0, %v202_v29  ;;  %v670_v32 = vsub.f32 %v174_v3, %v202_v29  ;;  %v672_v33 = vsub.f32 %v172_v1, %v202_v29 }
  0x2f   : > { %v674_v34 = vsub.f32 %v176_v10, %v202_v29  ;;  %v676_v35 = vsub.f32 %v175_v7, %v202_v29  ;;  %v688_v42 = vsub.f32 %v178_v16, %v202_v29  ;;  %v690_v43 = vsub.f32 %v177_v13, %v202_v29 }
  0x30   : > { %v213_v36 = vmul.f32 %v666_v30, %v666_v30  ;;  %v211_v37 = vmul.f32 %v668_v31, %v668_v31  ;;  %v214_v38 = vmul.f32 %v670_v32, %v670_v32  ;;  %v212_v39 = vmul.f32 %v672_v33, %v672_v33 }
  0x31   : > { %v216_v46 = vmul.f32 %v674_v34, %v674_v34  ;;  %v215_v47 = vmul.f32 %v676_v35, %v676_v35  ;;  %v218_v50 = vmul.f32 %v688_v42, %v688_v42  ;;  %v217_v51 = vmul.f32 %v690_v43, %v690_v43 }
  0x32   : > { %v225_v40 = vsel %vm179_vm0, %v213_v36, 0.0  ;;  %v219_v41 = vsel %vm179_vm0, %v211_v37, 0.0  ;;  %v228_v44 = vsel %vm179_vm0, %v214_v38, 0.0  ;;  %v222_v45 = vsel %vm179_vm0, %v212_v39, 0.0 }
  0x33   : > { %226 = vadd.xlane.f32.xlu1 %v225_v40  ;;  %220 = vadd.xlane.f32.xlu0 %v219_v41  ;;  %v234_v48 = vsel %vm179_vm0, %v216_v46, 0.0  ;;  %v231_v49 = vsel %vm179_vm0, %v215_v47, 0.0  ;;  %v240_v52 = vsel %vm179_vm0, %v218_v50, 0.0  ;;  %v237_v53 = vsel %vm179_vm0, %v217_v51, 0.0 }
  0x37   : > { %229 = vadd.xlane.f32.xlu1 %v228_v44  ;;  %223 = vadd.xlane.f32.xlu0 %v222_v45 }
  0x3b   : > { %235 = vadd.xlane.f32.xlu1 %v234_v48  ;;  %232 = vadd.xlane.f32.xlu0 %v231_v49 }
  0x3f   : > { %241 = vadd.xlane.f32.xlu1 %v240_v52  ;;  %238 = vadd.xlane.f32.xlu0 %v237_v53 }
  0xc0   : > { %v706_v55 = vpop.xlane.xlu1 %226  ;;  %v708_v56 = vpop.xlane.xlu0 %220 }
  0xc1   : > { %593 = vrsqrt.f32 %v706_v55  ;;  %vm259_vm1 = vcmp.eq.f32.partialorder %v706_v55, inf  ;;  %v262_v3 = vand.u32 2147483648, %v706_v55  ;;  %vm245_vm2 = vcmp.eq.f32.partialorder %v708_v56, inf }
  0xc2   : > { %595 = vrsqrt.f32 %v708_v56  ;;  %vm247_vm3 = vcmp.eq.f32.partialorder %v708_v56, 0.0  ;;  %v248_v4 = vand.u32 2147483648, %v708_v56  ;;  %vm261_vm8 = vcmp.eq.f32.partialorder %v706_v55, 0.0 }
  0xc4   : > { %v712_v57 = vpop.xlane.xlu1 %229  ;;  %v714_v58 = vpop.xlane.xlu0 %223 }
  0xc5   : > { %597 = vrsqrt.f32 %v712_v57  ;;  %vm266_vm4 = vcmp.eq.f32.partialorder %v712_v57, inf  ;;  %vm268_vm5 = vcmp.eq.f32.partialorder %v712_v57, 0.0  ;;  %v269_v6 = vand.u32 2147483648, %v712_v57 }
  0xc6   : > { %599 = vrsqrt.f32 %v714_v58  ;;  %vm252_vm6 = vcmp.eq.f32.partialorder %v714_v58, inf  ;;  %vm254_vm7 = vcmp.eq.f32.partialorder %v714_v58, 0.0  ;;  %v255_v11 = vand.u32 2147483648, %v714_v58 }
  0xc8   : > { %v236_v59 = vpop.xlane.xlu1 %235  ;;  %v233_v60 = vpop.xlane.xlu0 %232 }
  0xc9   : > { %601 = vrsqrt.f32 %v236_v59  ;;  %vm280_vm9 = vcmp.eq.f32.partialorder %v236_v59, inf  ;;  %vm282_vm10 = vcmp.eq.f32.partialorder %v236_v59, 0.0  ;;  %v283_v14 = vand.u32 2147483648, %v236_v59 }
  0xca   : > { %603 = vrsqrt.f32 %v233_v60  ;;  %vm273_vm11 = vcmp.eq.f32.partialorder %v233_v60, inf  ;;  %vm275_vm12 = vcmp.eq.f32.partialorder %v233_v60, 0.0  ;;  %v276_v16 = vand.u32 2147483648, %v233_v60 }
  0xcb   : > { %v594_v63 = vpop.eup %593 }
  0xcc   : > { %v242_v61 = vpop.xlane.xlu1 %241  ;;  %v718_v62 = vpop.xlane.xlu0 %238  ;;  %v258_v5 = vmul.f32 %v594_v63, %v706_v55 }
  0xcd   : > { %605 = vrsqrt.f32 %v242_v61  ;;  %v596_v0 = vpop.eup %595  ;;  %vm294_vm13 = vcmp.eq.f32.partialorder %v242_v61, inf  ;;  %vm296_vm14 = vcmp.eq.f32.partialorder %v242_v61, 0.0  ;;  %v297_v28 = vand.u32 2147483648, %v242_v61 }
  0xce   : > { %607 = vrsqrt.f32 %v718_v62  ;;  %v244_v8 = vmul.f32 %v596_v0, %v708_v56  ;;  %v260_v17 = vsel %vm259_vm1, %v706_v55, %v258_v5  ;;  %vm287_vm15 = vcmp.eq.f32.partialorder %v718_v62, inf }
  0xcf   : > { %v598_v1 = vpop.eup %597  ;;  %vm289_vm0 = vcmp.eq.f32.partialorder %v718_v62, 0.0  ;;  %v290_v36 = vand.u32 2147483648, %v718_v62  ;;  %v263_v47 = vsel %vm261_vm8, %v262_v3, %v260_v17  ;;  %v620_v0 = vmov 1  }
  0xd0   : > { %v600_v2 = vpop.eup %599  ;;  %v265_v9 = vmul.f32 %v598_v1, %v712_v57  ;;  %v246_v20 = vsel %vm245_vm2, %v708_v56, %v244_v8  ;;  %vm495_vm1 = vcmask 195584  }
  0xd1   : > { %v251_v10 = vmul.f32 %v600_v2, %v714_v58  ;;  %v249_v37 = vsel %vm247_vm3, %v248_v4, %v246_v20  ;;  %v792_v20 = vld [vmem:[%s839_s2] ss:$0 sm:$0xff] }
  0xd2   : > { %v267_v21 = vsel %vm266_vm4, %v712_v57, %v265_v9 }
  0xd3   : > { %v602_v7 = vpop.eup %601  ;;  %v253_v22 = vsel %vm252_vm6, %v714_v58, %v251_v10  ;;  %v270_v38 = vsel %vm268_vm5, %v269_v6, %v267_v21  ;;  %v568_v10 = vld [vmem:[%s838_s1] ss:$0 sm:$0xff] }
  0xd4   : > { %v604_v12 = vpop.eup %603  ;;  %v279_v13 = vmul.f32 %v602_v7, %v236_v59  ;;  %v256_v39 = vsel %vm254_vm7, %v255_v11, %v253_v22 }
  0xd5   : > { %v272_v15 = vmul.f32 %v604_v12, %v233_v60  ;;  %v569_v12 = vld [vmem:[%s838_s1 + $0x1] ss:$0 sm:$0xff] }
  0xd6   : > { %v281_v18 = vsel %vm280_vm9, %v236_v59, %v279_v13  ;;  %v786_v13 = vld [vmem:[%s838_s1 + $0x2] ss:$0 sm:$0xff] }
  0xd7   : > { %v606_v19 = vpop.eup %605  ;;  %v274_v23 = vsel %vm273_vm11, %v233_v60, %v272_v15  ;;  %v284_v25 = vsel %vm282_vm10, %v283_v14, %v281_v18 }
  0xd8   : > { %v608_v24 = vpop.eup %607  ;;  %v277_v26 = vsel %vm275_vm12, %v276_v16, %v274_v23  ;;  %v293_v27 = vmul.f32 %v606_v19, %v242_v61  ;;  %v300_v41 = vmax.f32 %v256_v39, %v284_v25 }
  0xd9   : > { %v286_v29 = vmul.f32 %v608_v24, %v718_v62  ;;  %v299_v44 = vmax.f32 %v249_v37, %v277_v26 }
  0xda   : > { %v295_v40 = vsel %vm294_vm13, %v242_v61, %v293_v27 }
  0xdb   : > { %v298_v45 = vsel %vm296_vm14, %v297_v28, %v295_v40  ;;  %v288_v46 = vsel %vm287_vm15, %v718_v62, %v286_v29  ;;  %v303_v51 = vmax.f32 %v299_v44, %v300_v41 }
  0xdc   : > { %v302_v48 = vmax.f32 %v270_v38, %v298_v45  ;;  %v291_v49 = vsel %vm289_vm0, %v290_v36, %v288_v46 }
  0xdd   : > { %v301_v50 = vmax.f32 %v263_v47, %v291_v49 }
  0xdf   : > { %v304_v52 = vmax.f32 %v301_v50, %v302_v48 }
  0xe1   : > { %v305_v53 = vmax.f32 %v303_v51, %v304_v52 }
  0xe3   : > { %v306_v54 = vrot.slane %v305_v53, 4 }
  0xe5   : > { %v307_v56 = vmax.f32 %v305_v53, %v306_v54 }
  0xe7   : > { %v308_v57 = vrot.slane %v307_v56, 2 }
  0xe9   : > { %v309_v58 = vmax.f32 %v307_v56, %v308_v57 }
  0xeb   : > { %v310_v59 = vrot.slane %v309_v58, 1 }
  0xed   : > { %v311_v60 = vmax.f32 %v309_v58, %v310_v59 }
  0xef   : > { %609 = vrcp.f32 %v311_v60 }
  0xf9   : > { %v610_v61 = vpop.eup %609 }
  0xfa   : > { %v314_v63 = vmul.f32 %v610_v61, %v672_v33  ;;  %v313_v62 = vmul.f32 %v610_v61, %v668_v31  ;;  %v315_v55 = vmul.f32 %v610_v61, %v666_v30  ;;  %v316_v1 = vmul.f32 %v610_v61, %v670_v32 }
  0xfb   : > { %v317_v2 = vmul.f32 %v610_v61, %v676_v35  ;;  %v319_v3 = vmul.f32 %v610_v61, %v690_v43  ;;  %v318_v31 = vmul.f32 %v610_v61, %v674_v34  ;;  %v621_v33 = vmov 2  }
  0xfc   : > { %329 = vperm.xlu1 %588, %v314_v63   ;;  %324 = vperm.xlu0 %587, %v313_v62   ;;  %v320_v30 = vmul.f32 %v610_v61, %v688_v42 }
 0x100   : > { %334 = vperm.xlu1 %588, %v315_v55   ;;  %590 = vset.pattern.permute.xlu0 %v620_v0 }
 0x101   : > { %380 = vperm.xlu0 %590, %v314_v63  }
 0x104   : > { %339 = vperm.xlu1 %588, %v316_v1  }
 0x105   : > { %392 = vperm.xlu0 %590, %v317_v2  }
 0x108   : > { %344 = vperm.xlu1 %588, %v317_v2  }
 0x109   : > { %400 = vperm.xlu0 %590, %v319_v3  }
 0x10c   : > { %349 = vperm.xlu1 %588, %v318_v31  }
 0x10d   : > { %591 = vset.pattern.permute.xlu0 %v621_v33 }
 0x10e   : > { %429 = vperm.xlu0 %591, %v313_v62  }
 0x110   : > { %354 = vperm.xlu1 %588, %v319_v3  }
 0x112   : > { %441 = vperm.xlu0 %591, %v316_v1  }
 0x114   : > { %359 = vperm.xlu1 %588, %v320_v30  }
 0x116   : > { %449 = vperm.xlu0 %591, %v318_v31  }
 0x118   : > { %589 = vset.pattern.permute.xlu1 %v620_v0 }
 0x119   : > { %376 = vperm.xlu1 %589, %v313_v62  }
 0x11a   : > { %457 = vperm.xlu0 %591, %v320_v30  }
 0x11d   : > { %384 = vperm.xlu1 %589, %v315_v55  }
 0x121   : > { %388 = vperm.xlu1 %589, %v316_v1  }
 0x125   : > { %396 = vperm.xlu1 %589, %v318_v31  }
 0x129   : > { %404 = vperm.xlu1 %589, %v320_v30  }
 0x12d   : > { %592 = vset.pattern.permute.xlu1 %v621_v33 }
 0x12e   : > { %433 = vperm.xlu1 %592, %v314_v63  }
 0x132   : > { %437 = vperm.xlu1 %592, %v315_v55  }
 0x136   : > { %445 = vperm.xlu1 %592, %v317_v2  }
 0x13a   : > { %453 = vperm.xlu1 %592, %v319_v3  }
 0x17b   : > { %v330_v32 = vpop.permute.xlu1 %329  ;;  %v325_v34 = vpop.permute.xlu0 %324 }
 0x17c   : > { %v366_v15 = vmul.f32 %v568_v10, %v325_v34  ;;  %v367_v54 = vmul.f32 %v568_v10, %v330_v32 }
 0x17f   : > { %v335_v35 = vpop.permute.xlu1 %334 }
 0x180   : > { %v381_v4 = vpop.permute.xlu0 %380  ;;  %v368_v63 = vmul.f32 %v568_v10, %v335_v35 }
 0x181   : > { %v412_v50 = vmul.f32 %v569_v12, %v381_v4 }
 0x183   : > { %v340_v43 = vpop.permute.xlu1 %339  ;;  %v420_v58 = vadd.f32 %v412_v50, %v367_v54 }
 0x184   : > { %v393_v5 = vpop.permute.xlu0 %392  ;;  %v369_v25 = vmul.f32 %v568_v10, %v340_v43 }
 0x185   : > { %v415_v31 = vmul.f32 %v569_v12, %v393_v5 }
 0x187   : > { %v345_v42 = vpop.permute.xlu1 %344 }
 0x188   : > { %v775_v8 = vpop.permute.xlu0 %400  ;;  %v370_v0 = vmul.f32 %v568_v10, %v345_v42 }
 0x189   : > { %v417_v4 = vmul.f32 %v569_v12, %v775_v8 }
 0x18a   : > { %v423_v32 = vadd.f32 %v415_v31, %v370_v0 }
 0x18b   : > { %v350_v6 = vpop.permute.xlu1 %349 }
 0x18c   : > { %v371_v37 = vmul.f32 %v568_v10, %v350_v6 }
 0x18d   : > { %v430_v11 = vpop.permute.xlu0 %429 }
 0x18e   : > { %v464_v17 = vmul.f32 %v786_v13, %v430_v11 }
 0x18f   : > { %v773_v7 = vpop.permute.xlu1 %354 }
 0x190   : > { %v372_v34 = vmul.f32 %v568_v10, %v773_v7 }
 0x191   : > { %v442_v19 = vpop.permute.xlu0 %441 }
 0x192   : > { %v467_v28 = vmul.f32 %v786_v13, %v442_v19 }
 0x193   : > { %v360_v9 = vpop.permute.xlu1 %359 }
 0x194   : > { %v373_v47 = vmul.f32 %v568_v10, %v360_v9  ;;  %v425_v9 = vadd.f32 %v417_v4, %v372_v34 }
 0x195   : > { %v450_v27 = vpop.permute.xlu0 %449 }
 0x196   : > { %v469_v40 = vmul.f32 %v786_v13, %v450_v27 }
 0x198   : > { %v377_v14 = vpop.permute.xlu1 %376 }
 0x199   : > { %v411_v16 = vmul.f32 %v569_v12, %v377_v14  ;;  %v458_v45 = vpop.permute.xlu0 %457 }
 0x19a   : > { %v471_v51 = vmul.f32 %v786_v13, %v458_v45 }
 0x19b   : > { %v419_v18 = vadd.f32 %v411_v16, %v366_v15 }
 0x19c   : > { %v385_v21 = vpop.permute.xlu1 %384 }
 0x19d   : > { %v472_v22 = vadd.f32 %v464_v17, %v419_v18  ;;  %v413_v59 = vmul.f32 %v569_v12, %v385_v21 }
 0x19f   : > { %v487_v23 = vadd.f32 %v792_v20, %v472_v22  ;;  %v421_v1 = vadd.f32 %v413_v59, %v368_v63 }
 0x1a0   : > { %v389_v24 = vpop.permute.xlu1 %388 }
 0x1a1   : > { %496 = vst.msk [vmem:[%s799_s28] sm:$0xff] %vm495_vm1, %v487_v23  ;;  %v414_v26 = vmul.f32 %v569_v12, %v389_v24 }
 0x1a3   : > { %v422_v29 = vadd.f32 %v414_v26, %v369_v25 }
 0x1a4   : > { %v397_v36 = vpop.permute.xlu1 %396 }
 0x1a5   : > { %v475_v38 = vadd.f32 %v467_v28, %v422_v29  ;;  %v416_v39 = vmul.f32 %v569_v12, %v397_v36 }
 0x1a7   : > { %v490_v41 = vadd.f32 %v792_v20, %v475_v38  ;;  %v424_v44 = vadd.f32 %v416_v39, %v371_v37 }
 0x1a8   : > { %v405_v46 = vpop.permute.xlu1 %404 }
 0x1a9   : > { %499 = vst.msk [vmem:[%s799_s28 + $0x18] sm:$0xff] %vm495_vm1, %v490_v41  ;;  %v477_v48 = vadd.f32 %v469_v40, %v424_v44  ;;  %v418_v49 = vmul.f32 %v569_v12, %v405_v46 }
 0x1ab   : > { %v492_v52 = vadd.f32 %v792_v20, %v477_v48  ;;  %v426_v53 = vadd.f32 %v418_v49, %v373_v47 }
 0x1ad   : > { %501 = vst.msk [vmem:[%s799_s28 + $0x28] sm:$0xff] %vm495_vm1, %v492_v52  ;;  %v479_v56 = vadd.f32 %v471_v51, %v426_v53  ;;  %v434_v57 = vpop.permute.xlu1 %433 }
 0x1ae   : > { %v465_v60 = vmul.f32 %v786_v13, %v434_v57 }
 0x1af   : > { %v494_v61 = vadd.f32 %v792_v20, %v479_v56 }
 0x1b0   : > { %v473_v62 = vadd.f32 %v465_v60, %v420_v58 }
 0x1b1   : > { %503 = vst.msk [vmem:[%s799_s28 + $0x38] sm:$0xff] %vm495_vm1, %v494_v61  ;;  %v438_v55 = vpop.permute.xlu1 %437 }
 0x1b2   : > { %v488_v2 = vadd.f32 %v792_v20, %v473_v62  ;;  %v466_v3 = vmul.f32 %v786_v13, %v438_v55 }
 0x1b4   : > { %497 = vst.msk [vmem:[%s799_s28 + $0x8] sm:$0xff] %vm495_vm1, %v488_v2  ;;  %v474_v33 = vadd.f32 %v466_v3, %v421_v1 }
 0x1b5   : > { %v446_v30 = vpop.permute.xlu1 %445 }
 0x1b6   : > { %v489_v35 = vadd.f32 %v792_v20, %v474_v33  ;;  %v468_v43 = vmul.f32 %v786_v13, %v446_v30 }
 0x1b8   : > { %498 = vst.msk [vmem:[%s799_s28 + $0x10] sm:$0xff] %vm495_vm1, %v489_v35  ;;  %v476_v42 = vadd.f32 %v468_v43, %v423_v32 }
 0x1b9   : > { %v454_v6 = vpop.permute.xlu1 %453 }
 0x1ba   : > { %v491_v5 = vadd.f32 %v792_v20, %v476_v42  ;;  %v470_v11 = vmul.f32 %v786_v13, %v454_v6 }
 0x1bc   : > { %500 = vst.msk [vmem:[%s799_s28 + $0x20] sm:$0xff] %vm495_vm1, %v491_v5  ;;  %v478_v14 = vadd.f32 %v470_v11, %v425_v9 }
 0x1be   : > { %v493_v7 = vadd.f32 %v792_v20, %v478_v14 }
 0x1c0   : > { %502 = vst.msk [vmem:[%s799_s28 + $0x30] sm:$0xff] %vm495_vm1, %v493_v7 }
 0x1c1 PF: > { %s13_s12 = sadd.s32 1, %s617_s12  }
 0x1c2   : > { %p10_p4 = scmp.ge.s32.totalorder %s13_s12, 4  }
 0x1c4   :  { %12 = sbr.rel (!%p10_p4) target bundleno = 1 (0x1), region = 62 }

</bundles_post_ra>
